<compile_context>
chip_gen: v7x
topology: tpu7x:2x2x1
jax: 0.10.0
libtpu: 0.0.40
codegen_flags: <defaults>
</compile_context>

<pallas_src>
import functools
import math

import jax
import jax.numpy as jnp
from jax import lax
from jax.experimental import pallas as pl
from jax.experimental.pallas import tpu as pltpu


def _eos_attn_pool_kernel(x_ref, wsc_ref, bsc_ref, wv_ref, bv_ref, m_ref,
                          g_ref, wo_ref, bo_ref, lng_ref, lnb_ref, o_ref,
                          *, eps):
    """One grid step: Bb batch elements, N = Bb*T flattened token rows.

    x_ref   : (N, D)   last-T tokens of Bb consecutive batches, row-flattened
    wsc_ref : (D, H)   key projection folded with the (scaled) query + head mask
    bsc_ref : (1, H)
    wv_ref  : (D, D)   value projection, pre-transposed to (in, out)
    bv_ref  : (1, D)
    m_ref   : (H, D)   head membership  M[h, j] = 1 iff j // head_dim == h
    g_ref   : (Bb, N)  batch membership G[b, n] = 1 iff n // T == b
    wo_ref  : (D, D)   output projection, pre-transposed to (in, out)
    o_ref   : (Bb, D)
    """
    x = x_ref[...].astype(jnp.float32)                                  # (N, D)
    m = m_ref[...]                                                      # (H, D)
    g = g_ref[...]                                                      # (Bb, N)

    # ---- value projection: one tall (N, D) @ (D, D) MXU matmul ----
    v = jnp.dot(x, wv_ref[...], preferred_element_type=jnp.float32) + bv_ref[...]   # (N, D)

    # ---- per-head attention scores of the single pooled query vs every token
    # (query projection, 1/sqrt(hd) scale and head mask pre-folded host-side).
    s = jnp.dot(x, wsc_ref[...], preferred_element_type=jnp.float32) + bsc_ref[...]  # (N, H)

    # ---- softmax over the T tokens of each batch element ----
    # The per-head column max is constant inside every (batch, head) softmax
    # group, so the result is mathematically exact; it only assumes
    # cross-batch logit gaps within one block stay well below ~87 (true for
    # any sane attention logits).
    e = jnp.exp(s - jnp.max(s, axis=0, keepdims=True))                  # (N, H)

    # Unnormalized weighted value sums + matching normalizers via group/head
    # membership matmuls (no reshapes, no per-batch loops):
    #   num[b, j] = sum_t e[b*T+t, head(j)] * v[b*T+t, j]
    #   den[b, j] = sum_t e[b*T+t, head(j)]
    efull = jnp.dot(e, m, preferred_element_type=jnp.float32)           # (N, D)
    num = jnp.dot(g, efull * v, preferred_element_type=jnp.float32)     # (Bb, D)
    den = jnp.dot(jnp.dot(g, e, preferred_element_type=jnp.float32), m,
                  preferred_element_type=jnp.float32)                   # (Bb, D)
    attn = num * pl.reciprocal(den, approx=True)                        # (Bb, D)

    # ---- output projection + LayerNorm over D ----
    y = jnp.dot(attn, wo_ref[...], preferred_element_type=jnp.float32) + bo_ref[...]  # (Bb, D)
    mu = jnp.mean(y, axis=-1, keepdims=True)
    var = jnp.mean((y - mu) ** 2, axis=-1, keepdims=True)
    yn = (y - mu) * lax.rsqrt(var + eps)
    o_ref[...] = (yn * lng_ref[...] + lnb_ref[...]).astype(o_ref.dtype)


def eos_attention_pooler(hidden, params, *, num_tokens, num_heads=8, eps=1e-5,
                         block_rows=256):
    """hidden: (B, S, D) last hidden state.  Returns pooled + LayerNorm'd (B, D)."""
    B, S, D = hidden.shape
    T = int(num_tokens)
    H = int(num_heads)
    assert S >= T, "sequence shorter than num_tokens"
    assert D % H == 0, "embed dim must be divisible by num_heads"
    hd = D // H
    f32 = jnp.float32

    # ---- batch tile: largest divisor of B with Bb*T <= block_rows (>= 1) ----
    max_bb = max(1, block_rows // T)
    Bb = max(c for c in range(1, B + 1) if B % c == 0 and c <= max_bb)
    N = Bb * T

    # ---- host-side, batch-invariant precompute (done once, not per grid step)
    wq = params["wq"].astype(f32)
    wk = params["wk"].astype(f32)
    wv = params["wv"].astype(f32)
    wo = params["wo"].astype(f32)
    bq = params["bq"].astype(f32).reshape(1, D)
    bk = params["bk"].astype(f32).reshape(1, D)
    bv = params["bv"].astype(f32).reshape(1, D)
    bo = params["bo"].astype(f32).reshape(1, D)
    cls_q = params["cls_q"].astype(f32).reshape(1, D)
    ln_g = params["ln_g"].astype(f32).reshape(1, D)
    ln_b = params["ln_b"].astype(f32).reshape(1, D)

    scale = 1.0 / math.sqrt(hd)
    q = (cls_q @ wq.T + bq) * scale                                     # (1, D) pre-scaled query
    head_of = jnp.arange(D, dtype=jnp.int32) // hd
    M = (jnp.arange(H, dtype=jnp.int32)[:, None] == head_of[None, :]).astype(f32)  # (H, D)
    Mt = M.T                                                            # (D, H)
    # Fold (scaled) query + head mask into the key projection:
    #   scores = x @ w_score + b_score  ==  per-head  q . (x @ Wk.T + bk) / sqrt(hd)
    w_score = wk.T @ (q.reshape(D, 1) * Mt)                             # (D, H)
    b_score = (q * bk) @ Mt                                             # (1, H)
    wv_t = wv.T                                                         # (D, D) as (in, out)
    wo_t = wo.T                                                         # (D, D) as (in, out)

    # Batch-group membership for the per-batch softmax inside one block.
    row_b = jnp.arange(N, dtype=jnp.int32) // T
    G = (jnp.arange(Bb, dtype=jnp.int32)[:, None] == row_b[None, :]).astype(f32)   # (Bb, N)

    # Last-T-token window, flattened so the kernel works on 2-D row blocks.
    # TODO(synk): when (S - T) % T == 0 this window could be selected directly
    # in the x index_map (block index (S-T)//T) to avoid materializing the
    # sliced copy in HBM.
    x2 = hidden[:, S - T:, :].reshape(B * T, D)

    # ---- VMEM budget: double-buffered inputs + f32 working set + headroom ----
    in_elems = (N * D + D * H + H + D * D + D + H * D + Bb * N
                + D * D + D + D + D)
    work_elems = 6 * N * D + 8 * Bb * D
    vmem_limit = int(min(64 * 1024 * 1024,
                         max(16 * 1024 * 1024,
                             4 * (2 * in_elems + work_elems) + (1 << 20))))

    kernel = functools.partial(_eos_attn_pool_kernel, eps=eps)
    rep = lambda i: (0, 0)      # replicated (batch-invariant) operands

    return pl.pallas_call(
        kernel,
        out_shape=jax.ShapeDtypeStruct((B, D), hidden.dtype),
        grid_spec=pltpu.PrefetchScalarGridSpec(
            num_scalar_prefetch=0,
            grid=(B // Bb,),
            in_specs=[
                pl.BlockSpec((N, D), lambda i: (i, 0)),   # token rows of this batch tile
                pl.BlockSpec((D, H), rep),                # w_score (q/scale/mask folded)
                pl.BlockSpec((1, H), rep),                # b_score
                pl.BlockSpec((D, D), rep),                # Wv^T
                pl.BlockSpec((1, D), rep),                # bv
                pl.BlockSpec((H, D), rep),                # head mask M
                pl.BlockSpec((Bb, N), rep),               # batch-group mask G
                pl.BlockSpec((D, D), rep),                # Wo^T
                pl.BlockSpec((1, D), rep),                # bo
                pl.BlockSpec((1, D), rep),                # LayerNorm gamma
                pl.BlockSpec((1, D), rep),                # LayerNorm beta
            ],
            out_specs=pl.BlockSpec((Bb, D), lambda i: (i, 0)),
        ),
        compiler_params=pltpu.CompilerParams(
            dimension_semantics=("parallel",),
            vmem_limit_bytes=vmem_limit,
        ),
    )(x2, w_score, b_score, wv_t, bv, M, G, wo_t, bo, ln_g, ln_b)


def _reference(hidden, params, *, num_tokens, num_heads=8, eps=1e-5):
    """Pure-JAX reference of the PyTorch forward (for validation)."""
    B, S, D = hidden.shape
    hd = D // num_heads
    x = hidden[:, -num_tokens:, :]
    T = x.shape[1]
    q = params["cls_q"] @ params["wq"].T + params["bq"]                 # (1, D)
    k = jnp.einsum("btd,ed->bte", x, params["wk"]) + params["bk"]       # (B, T, D)
    v = jnp.einsum("btd,ed->bte", x, params["wv"]) + params["bv"]
    qh = q.reshape(1, num_heads, hd)
    kh = k.reshape(B, T, num_heads, hd)
    vh = v.reshape(B, T, num_heads, hd)
    s = jnp.einsum("qhd,bthd->bht", qh, kh) / math.sqrt(hd)
    p = jax.nn.softmax(s, axis=-1)
    o = jnp.einsum("bht,bthd->bhd", p, vh).reshape(B, D)
    y = o @ params["wo"].T + params["bo"][0]
    mu = y.mean(-1, keepdims=True)
    var = ((y - mu) ** 2).mean(-1, keepdims=True)
    return (y - mu) / jnp.sqrt(var + eps) * params["ln_g"][0] + params["ln_b"][0]


def _init_params(key, in_dim, *, std=0.02, bias_std=0.0):
    """Synthetic parameters mirroring the module's shapes.

    The real module uses trunc_normal(std=0.02) weights and zero biases; the
    test below uses larger std so the softmax / LayerNorm paths are exercised
    with non-trivial numerics.
    """
    ks = jax.random.split(key, 9)

    def tn(k, shape, s):
        return s * jax.random.truncated_normal(k, -2.0, 2.0, shape, jnp.float32)

    D = in_dim
    return {
        "cls_q": tn(ks[0], (1, D), std),
        "wq": tn(ks[1], (D, D), std),
        "wk": tn(ks[2], (D, D), std),
        "wv": tn(ks[3], (D, D), std),
        "wo": tn(ks[4], (D, D), std),
        "bq": tn(ks[5], (1, D), bias_std),
        "bk": tn(ks[6], (1, D), bias_std),
        "bv": tn(ks[7], (1, D), bias_std),
        "bo": tn(ks[8], (1, D), bias_std),
        "ln_g": jnp.ones((1, D), jnp.float32),
        "ln_b": jnp.zeros((1, D), jnp.float32),
    }


if __name__ == "__main__":
    B, S, D = 2, 16, 32       # batch, seq len of last hidden state, embed dim
    NUM_TOKENS = 8            # pooler keeps the last 8 tokens
    NUM_HEADS = 8             # nn.MultiheadAttention(in_dim, 8)

    key = jax.random.PRNGKey(0)
    k_x, k_p = jax.random.split(key)
    hidden = jax.random.normal(k_x, (B, S, D), jnp.float32)
    params = _init_params(k_p, D, std=0.5, bias_std=0.1)

    out = eos_attention_pooler(hidden, params, num_tokens=NUM_TOKENS,
                               num_heads=NUM_HEADS)
    out = jax.block_until_ready(out)

    ref = _reference(hidden, params, num_tokens=NUM_TOKENS, num_heads=NUM_HEADS)
    assert out.shape == (B, D)
    assert jnp.allclose(out, ref, rtol=1e-2, atol=1e-2), "mismatch vs reference"

    print("KERNEL_OK")
</pallas_src>

<mosaic_0001>
module attributes {stable_mosaic.version = 11 : i64} {
  func.func @_eos_attn_pool_kernel(%arg0: i32, %arg1: memref<16x32xf32, #tpu.memory_space<vmem>>, %arg2: memref<32x8xf32, #tpu.memory_space<vmem>>, %arg3: memref<1x8xf32, #tpu.memory_space<vmem>>, %arg4: memref<32x32xf32, #tpu.memory_space<vmem>>, %arg5: memref<1x32xf32, #tpu.memory_space<vmem>>, %arg6: memref<8x32xf32, #tpu.memory_space<vmem>>, %arg7: memref<2x16xf32, #tpu.memory_space<vmem>>, %arg8: memref<32x32xf32, #tpu.memory_space<vmem>>, %arg9: memref<1x32xf32, #tpu.memory_space<vmem>>, %arg10: memref<1x32xf32, #tpu.memory_space<vmem>>, %arg11: memref<1x32xf32, #tpu.memory_space<vmem>>, %arg12: memref<2x32xf32, #tpu.memory_space<vmem>>) attributes {dimension_semantics = [#tpu.dimension_semantics<parallel>], iteration_bounds = array<i64: 1>, scalar_prefetch = 0 : i64, scratch_operands = 0 : i64, tpu.core_type = #tpu.core_type<tc>, window_params = [{transform_indices = @transform_0, window_bounds = array<i64: 16, 32>}, {pipeline_mode = #tpu.pipeline_mode<synchronous>, transform_indices = @transform_1, window_bounds = array<i64: 32, 8>}, {pipeline_mode = #tpu.pipeline_mode<synchronous>, transform_indices = @transform_2, window_bounds = array<i64: 1, 8>}, {pipeline_mode = #tpu.pipeline_mode<synchronous>, transform_indices = @transform_3, window_bounds = array<i64: 32, 32>}, {pipeline_mode = #tpu.pipeline_mode<synchronous>, transform_indices = @transform_4, window_bounds = array<i64: 1, 32>}, {pipeline_mode = #tpu.pipeline_mode<synchronous>, transform_indices = @transform_5, window_bounds = array<i64: 8, 32>}, {pipeline_mode = #tpu.pipeline_mode<synchronous>, transform_indices = @transform_6, window_bounds = array<i64: 2, 16>}, {pipeline_mode = #tpu.pipeline_mode<synchronous>, transform_indices = @transform_7, window_bounds = array<i64: 32, 32>}, {pipeline_mode = #tpu.pipeline_mode<synchronous>, transform_indices = @transform_8, window_bounds = array<i64: 1, 32>}, {pipeline_mode = #tpu.pipeline_mode<synchronous>, transform_indices = @transform_9, window_bounds = array<i64: 1, 32>}, {pipeline_mode = #tpu.pipeline_mode<synchronous>, transform_indices = @transform_10, window_bounds = array<i64: 1, 32>}, {transform_indices = @transform_11, window_bounds = array<i64: 2, 32>}]} {
    %c0 = arith.constant 0 : index
    %c0_0 = arith.constant 0 : index
    %0 = vector.load %arg1[%c0, %c0_0] : memref<16x32xf32, #tpu.memory_space<vmem>>, vector<16x32xf32>
    %c0_1 = arith.constant 0 : index
    %c0_2 = arith.constant 0 : index
    %1 = vector.load %arg6[%c0_1, %c0_2] : memref<8x32xf32, #tpu.memory_space<vmem>>, vector<8x32xf32>
    %c0_3 = arith.constant 0 : index
    %c0_4 = arith.constant 0 : index
    %2 = vector.load %arg7[%c0_3, %c0_4] : memref<2x16xf32, #tpu.memory_space<vmem>>, vector<2x16xf32>
    %c0_5 = arith.constant 0 : index
    %c0_6 = arith.constant 0 : index
    %3 = vector.load %arg4[%c0_5, %c0_6] : memref<32x32xf32, #tpu.memory_space<vmem>>, vector<32x32xf32>
    %cst = arith.constant dense<0.000000e+00> : vector<16x32xf32>
    %4 = tpu.matmul %0, %3, %cst {dimension_numbers = #tpu.dot_dimension_numbers<[1], [0], [0], [1], [0, 0, 1, 1], [], []>} : vector<16x32xf32>, vector<32x32xf32>, vector<16x32xf32> -> vector<16x32xf32>
    %c0_7 = arith.constant 0 : index
    %c0_8 = arith.constant 0 : index
    %5 = vector.load %arg5[%c0_7, %c0_8] : memref<1x32xf32, #tpu.memory_space<vmem>>, vector<1x32xf32>
    %6 = vector.broadcast %5 : vector<1x32xf32> to vector<16x32xf32>
    %7 = arith.addf %4, %6 : vector<16x32xf32>
    %c0_9 = arith.constant 0 : index
    %c0_10 = arith.constant 0 : index
    %8 = vector.load %arg2[%c0_9, %c0_10] : memref<32x8xf32, #tpu.memory_space<vmem>>, vector<32x8xf32>
    %cst_11 = arith.constant dense<0.000000e+00> : vector<16x8xf32>
    %9 = tpu.matmul %0, %8, %cst_11 {dimension_numbers = #tpu.dot_dimension_numbers<[1], [0], [0], [1], [0, 0, 1, 1], [], []>} : vector<16x32xf32>, vector<32x8xf32>, vector<16x8xf32> -> vector<16x8xf32>
    %c0_12 = arith.constant 0 : index
    %c0_13 = arith.constant 0 : index
    %10 = vector.load %arg3[%c0_12, %c0_13] : memref<1x8xf32, #tpu.memory_space<vmem>>, vector<1x8xf32>
    %11 = vector.broadcast %10 : vector<1x8xf32> to vector<16x8xf32>
    %12 = arith.addf %9, %11 : vector<16x8xf32>
    %cst_14 = arith.constant dense<0xFF800000> : vector<8xf32>
    %13 = vector.multi_reduction <maximumf>, %12, %cst_14 [0] : vector<16x8xf32> to vector<8xf32>
    %14 = vector.shape_cast %13 : vector<8xf32> to vector<1x8xf32>
    %15 = vector.broadcast %14 : vector<1x8xf32> to vector<16x8xf32>
    %16 = arith.subf %12, %15 : vector<16x8xf32>
    %17 = math.exp %16 : vector<16x8xf32>
    %cst_15 = arith.constant dense<0.000000e+00> : vector<16x32xf32>
    %18 = tpu.matmul %17, %1, %cst_15 {dimension_numbers = #tpu.dot_dimension_numbers<[1], [0], [0], [1], [0, 0, 1, 1], [], []>} : vector<16x8xf32>, vector<8x32xf32>, vector<16x32xf32> -> vector<16x32xf32>
    %19 = arith.mulf %18, %7 : vector<16x32xf32>
    %cst_16 = arith.constant dense<0.000000e+00> : vector<2x32xf32>
    %20 = tpu.matmul %2, %19, %cst_16 {dimension_numbers = #tpu.dot_dimension_numbers<[1], [0], [0], [1], [0, 0, 1, 1], [], []>} : vector<2x16xf32>, vector<16x32xf32>, vector<2x32xf32> -> vector<2x32xf32>
    %cst_17 = arith.constant dense<0.000000e+00> : vector<2x8xf32>
    %21 = tpu.matmul %2, %17, %cst_17 {dimension_numbers = #tpu.dot_dimension_numbers<[1], [0], [0], [1], [0, 0, 1, 1], [], []>} : vector<2x16xf32>, vector<16x8xf32>, vector<2x8xf32> -> vector<2x8xf32>
    %cst_18 = arith.constant dense<0.000000e+00> : vector<2x32xf32>
    %22 = tpu.matmul %21, %1, %cst_18 {dimension_numbers = #tpu.dot_dimension_numbers<[1], [0], [0], [1], [0, 0, 1, 1], [], []>} : vector<2x8xf32>, vector<8x32xf32>, vector<2x32xf32> -> vector<2x32xf32>
    %23 = tpu.reciprocal %22 {approx = true} : vector<2x32xf32> -> vector<2x32xf32>
    %24 = arith.mulf %20, %23 : vector<2x32xf32>
    %c0_19 = arith.constant 0 : index
    %c0_20 = arith.constant 0 : index
    %25 = vector.load %arg8[%c0_19, %c0_20] : memref<32x32xf32, #tpu.memory_space<vmem>>, vector<32x32xf32>
    %cst_21 = arith.constant dense<0.000000e+00> : vector<2x32xf32>
    %26 = tpu.matmul %24, %25, %cst_21 {dimension_numbers = #tpu.dot_dimension_numbers<[1], [0], [0], [1], [0, 0, 1, 1], [], []>} : vector<2x32xf32>, vector<32x32xf32>, vector<2x32xf32> -> vector<2x32xf32>
    %c0_22 = arith.constant 0 : index
    %c0_23 = arith.constant 0 : index
    %27 = vector.load %arg9[%c0_22, %c0_23] : memref<1x32xf32, #tpu.memory_space<vmem>>, vector<1x32xf32>
    %28 = vector.broadcast %27 : vector<1x32xf32> to vector<2x32xf32>
    %29 = arith.addf %26, %28 : vector<2x32xf32>
    %cst_24 = arith.constant dense<0.000000e+00> : vector<2xf32>
    %30 = vector.multi_reduction <add>, %29, %cst_24 [1] : vector<2x32xf32> to vector<2xf32>
    %31 = vector.shape_cast %30 : vector<2xf32> to vector<2x1xf32>
    %cst_25 = arith.constant 3.200000e+01 : f32
    %32 = vector.broadcast %cst_25 : f32 to vector<2x1xf32>
    %33 = arith.divf %31, %32 : vector<2x1xf32>
    %34 = vector.broadcast %33 : vector<2x1xf32> to vector<2x32xf32>
    %35 = arith.subf %29, %34 : vector<2x32xf32>
    %36 = arith.mulf %35, %35 : vector<2x32xf32>
    %cst_26 = arith.constant dense<0.000000e+00> : vector<2xf32>
    %37 = vector.multi_reduction <add>, %36, %cst_26 [1] : vector<2x32xf32> to vector<2xf32>
    %38 = vector.shape_cast %37 : vector<2xf32> to vector<2x1xf32>
    %cst_27 = arith.constant 3.200000e+01 : f32
    %39 = vector.broadcast %cst_27 : f32 to vector<2x1xf32>
    %40 = arith.divf %38, %39 : vector<2x1xf32>
    %41 = vector.broadcast %33 : vector<2x1xf32> to vector<2x32xf32>
    %42 = arith.subf %29, %41 : vector<2x32xf32>
    %cst_28 = arith.constant 9.99999974E-6 : f32
    %43 = vector.broadcast %cst_28 : f32 to vector<2x1xf32>
    %44 = arith.addf %40, %43 : vector<2x1xf32>
    %45 = math.rsqrt %44 : vector<2x1xf32>
    %46 = vector.broadcast %45 : vector<2x1xf32> to vector<2x32xf32>
    %47 = arith.mulf %42, %46 : vector<2x32xf32>
    %c0_29 = arith.constant 0 : index
    %c0_30 = arith.constant 0 : index
    %48 = vector.load %arg10[%c0_29, %c0_30] : memref<1x32xf32, #tpu.memory_space<vmem>>, vector<1x32xf32>
    %49 = vector.broadcast %48 : vector<1x32xf32> to vector<2x32xf32>
    %50 = arith.mulf %47, %49 : vector<2x32xf32>
    %c0_31 = arith.constant 0 : index
    %c0_32 = arith.constant 0 : index
    %51 = vector.load %arg11[%c0_31, %c0_32] : memref<1x32xf32, #tpu.memory_space<vmem>>, vector<1x32xf32>
    %52 = vector.broadcast %51 : vector<1x32xf32> to vector<2x32xf32>
    %53 = arith.addf %50, %52 : vector<2x32xf32>
    %c0_33 = arith.constant 0 : index
    %c0_34 = arith.constant 0 : index
    %54 = vector.load %arg12[%c0_33, %c0_34] : memref<2x32xf32, #tpu.memory_space<vmem>>, vector<2x32xf32>
    tpu.vector_store %arg12[%c0_33, %c0_34], %53 {strides = array<i32>} : memref<2x32xf32, #tpu.memory_space<vmem>>, vector<2x32xf32>,
    return
  }
  func.func @transform_0(%arg0: i32) -> (i32, i32) {
    %c0_i32 = arith.constant 0 : i32
    %c0_i32_0 = arith.constant 0 : i32
    return %arg0, %c0_i32 : i32, i32
  }
  func.func @transform_1(%arg0: i32) -> (i32, i32) {
    %c0_i32 = arith.constant 0 : i32
    %c0_i32_0 = arith.constant 0 : i32
    %c0_i32_1 = arith.constant 0 : i32
    return %c0_i32, %c0_i32_0 : i32, i32
  }
  func.func @transform_2(%arg0: i32) -> (i32, i32) {
    %c0_i32 = arith.constant 0 : i32
    %c0_i32_0 = arith.constant 0 : i32
    %c0_i32_1 = arith.constant 0 : i32
    return %c0_i32, %c0_i32_0 : i32, i32
  }
  func.func @transform_3(%arg0: i32) -> (i32, i32) {
    %c0_i32 = arith.constant 0 : i32
    %c0_i32_0 = arith.constant 0 : i32
    %c0_i32_1 = arith.constant 0 : i32
    return %c0_i32, %c0_i32_0 : i32, i32
  }
  func.func @transform_4(%arg0: i32) -> (i32, i32) {
    %c0_i32 = arith.constant 0 : i32
    %c0_i32_0 = arith.constant 0 : i32
    %c0_i32_1 = arith.constant 0 : i32
    return %c0_i32, %c0_i32_0 : i32, i32
  }
  func.func @transform_5(%arg0: i32) -> (i32, i32) {
    %c0_i32 = arith.constant 0 : i32
    %c0_i32_0 = arith.constant 0 : i32
    %c0_i32_1 = arith.constant 0 : i32
    return %c0_i32, %c0_i32_0 : i32, i32
  }
  func.func @transform_6(%arg0: i32) -> (i32, i32) {
    %c0_i32 = arith.constant 0 : i32
    %c0_i32_0 = arith.constant 0 : i32
    %c0_i32_1 = arith.constant 0 : i32
    return %c0_i32, %c0_i32_0 : i32, i32
  }
  func.func @transform_7(%arg0: i32) -> (i32, i32) {
    %c0_i32 = arith.constant 0 : i32
    %c0_i32_0 = arith.constant 0 : i32
    %c0_i32_1 = arith.constant 0 : i32
    return %c0_i32, %c0_i32_0 : i32, i32
  }
  func.func @transform_8(%arg0: i32) -> (i32, i32) {
    %c0_i32 = arith.constant 0 : i32
    %c0_i32_0 = arith.constant 0 : i32
    %c0_i32_1 = arith.constant 0 : i32
    return %c0_i32, %c0_i32_0 : i32, i32
  }
  func.func @transform_9(%arg0: i32) -> (i32, i32) {
    %c0_i32 = arith.constant 0 : i32
    %c0_i32_0 = arith.constant 0 : i32
    %c0_i32_1 = arith.constant 0 : i32
    return %c0_i32, %c0_i32_0 : i32, i32
  }
  func.func @transform_10(%arg0: i32) -> (i32, i32) {
    %c0_i32 = arith.constant 0 : i32
    %c0_i32_0 = arith.constant 0 : i32
    %c0_i32_1 = arith.constant 0 : i32
    return %c0_i32, %c0_i32_0 : i32, i32
  }
  func.func @transform_11(%arg0: i32) -> (i32, i32) {
    %c0_i32 = arith.constant 0 : i32
    %c0_i32_0 = arith.constant 0 : i32
    return %arg0, %c0_i32 : i32, i32
  }
}

</mosaic_0001>

<bundles_post_ra>
// kernel: tpu_custom_call.1
= control target key start
LH: loop header
LB: loop body
LE: loop exit
PB: predicated region body
PF: predicated region fallthrough
CT: control target
= control target key end

     0   :  { %16 = vsyncpa [#allocation3], 0  ;;  %s1195_s0 = inlined_call_operand.hbm [shape: f32[16,32], index: 0, kind: input, shape index: {}]   ;;  %s1196_s1 = inlined_call_operand.vmem [shape: f32[32,8], index: 1, kind: input, shape index: {}]   ;;  %s1197_s2 = inlined_call_operand.hbm [shape: f32[1,8], index: 2, kind: input, shape index: {}]   ;;  %s1198_s3 = inlined_call_operand.vmem [shape: f32[32,32], index: 3, kind: input, shape index: {}]   ;;  %s1199_s4 = inlined_call_operand.hbm [shape: f32[1,32], index: 4, kind: input, shape index: {}]   ;;  %s1200_s5 = inlined_call_operand.hbm [shape: f32[8,32], index: 5, kind: input, shape index: {}]   ;;  %s1201_s6 = inlined_call_operand.vmem [shape: f32[2,16], index: 6, kind: input, shape index: {}]   ;;  %s1202_s7 = inlined_call_operand.vmem [shape: f32[32,32], index: 7, kind: input, shape index: {}]   ;;  %s1203_s8 = inlined_call_operand.vmem [shape: f32[1,32], index: 8, kind: input, shape index: {}]   ;;  %s1204_s9 = inlined_call_operand.vmem [shape: f32[1,32], index: 9, kind: input, shape index: {}]   ;;  %s1205_s10 = inlined_call_operand.vmem [shape: f32[1,32], index: 10, kind: input, shape index: {}]   ;;  %s1206_s11 = inlined_call_operand.hbm [shape: f32[2,32], index: 11, kind: output, shape index: {}]  }
   0x1   :  { %17 = vsyncpa [#allocation6], 0 }
   0x2   :  { %18 = vsyncpa [#allocation9], 0 }
   0x3   :  { %19 = vsyncpa [#allocation4], 0  ;;  %s986_s17 = smov [#allocation5]   ;;  %s987_s19 = smov [#allocation2]  }
   0x4   :  { %s40_s18 = sshll.u32 %s986_s17, 4  ;;  %s25_s20 = sshll.u32 %s987_s19, 4  ;;  %s41_s18 = int_to_ptr.vmem [resolvable:$true] %s40_s18  ;;  %s1056_s20 = int_to_ptr.vmem [resolvable:$true] %s25_s20 }
   0x5   :  { %s868_s23 = scalar_lea.hbm %s1197_s2, 16 }
   0x6   :  { %p869_p0 = scmp.ne.s32.totalorder %s1197_s2, %s868_s23  ;;  %p872_p1 = scmp.lt.u32.totalorder %s868_s23, %s1197_s2 }
   0x8   :  { %p874_p2 = pnand %p872_p1, %p869_p0 }
   0xa   :  { %877 = shalt.err (!%p874_p2)
}
   0xb   :  { %s878_s28 = scalar_lea.vmem %s41_s18, 16  ;;  %s882_s29 = scalar_lea.vmem %s41_s18, 32 }
   0xc   :  { %p879_p3 = scmp.ne.s32.totalorder %s41_s18, %s878_s28  ;;  %p883_p4 = scmp.lt.s32.totalorder %s41_s18, %s41_s18 }
   0xd   :  { %p884_p5 = scmp.lt.s32.totalorder %s882_s29, %s878_s28 }
   0xf   :  { %p885_p6 = por %p884_p5, %p883_p4 }
  0x11   :  { %p886_p7 = pnand %p885_p6, %p879_p3 }
  0x13   :  { %889 = shalt.err (!%p886_p7)
}
  0x14   :  { %43 = dma.hbm_to_vmem [thread:$0]  %s1197_s2, 16, %s41_s18, [#allocation6]  }
  0x15   :  { %s890_s15 = scalar_lea.hbm %s1195_s0, 256 }
  0x16   :  { %p891_p8 = scmp.ne.s32.totalorder %s1195_s0, %s890_s15  ;;  %p894_p9 = scmp.lt.u32.totalorder %s890_s15, %s1195_s0 }
  0x18   :  { %p896_p10 = pnand %p894_p9, %p891_p8 }
  0x1a   :  { %899 = shalt.err (!%p896_p10)
}
  0x1b   :  { %s900_s22 = scalar_lea.vmem %s1056_s20, 256  ;;  %p905_p12 = scmp.lt.s32.totalorder %s1056_s20, %s1056_s20 }
  0x1c   :  { %p901_p11 = scmp.ne.s32.totalorder %s1056_s20, %s900_s22  ;;  %p906_p13 = scmp.lt.s32.totalorder %s900_s22, %s900_s22 }
  0x1e   :  { %p907_p0 = por %p906_p13, %p905_p12 }
  0x20   :  { %p908_p1 = pnand %p907_p0, %p901_p11 }
  0x22   :  { %911 = shalt.err (!%p908_p1)
}
  0x23   :  { %s988_s2 = smov 128   ;;  %s989_s18 = smov 8  }
  0x24   :  { %31 = dma.hbm_to_vmem [thread:$0]  %s1195_s0, 256, %s1056_s20, [#allocation3], %s988_s2, %s988_s2, %s989_s18  }
  0x25   :  { %s990_s25 = smov [#allocation7]   ;;  %s991_s27 = smov [#allocation8]  }
  0x26   :  { %s52_s26 = sshll.u32 %s990_s25, 4  ;;  %s62_s28 = sshll.u32 %s991_s27, 4  ;;  %s53_s26 = int_to_ptr.vmem [resolvable:$true] %s52_s26  ;;  %s63_s28 = int_to_ptr.vmem [resolvable:$true] %s62_s28 }
  0x27   :  { %s912_s12 = scalar_lea.hbm %s1199_s4, 16 }
  0x28   :  { %p913_p2 = scmp.ne.s32.totalorder %s1199_s4, %s912_s12  ;;  %p916_p3 = scmp.lt.u32.totalorder %s912_s12, %s1199_s4 }
  0x2a   :  { %p918_p4 = pnand %p916_p3, %p913_p2 }
  0x2c   :  { %921 = shalt.err (!%p918_p4)
}
  0x2d   :  { %s922_s0 = scalar_lea.vmem %s53_s26, 16  ;;  %s926_s20 = scalar_lea.vmem %s53_s26, 32 }
  0x2e   :  { %p923_p5 = scmp.ne.s32.totalorder %s53_s26, %s922_s0  ;;  %p927_p6 = scmp.lt.s32.totalorder %s53_s26, %s53_s26 }
  0x2f   :  { %p928_p7 = scmp.lt.s32.totalorder %s926_s20, %s922_s0 }
  0x31   :  { %p929_p8 = por %p928_p7, %p927_p6 }
  0x33   :  { %p930_p9 = pnand %p929_p8, %p923_p5 }
  0x35   :  { %933 = shalt.err (!%p930_p9)
}
  0x36   :  { %55 = dma.hbm_to_vmem [thread:$0]  %s1199_s4, 16, %s53_s26, [#allocation6]  }
  0x37   :  { %s934_s2 = scalar_lea.hbm %s1200_s5, 128 }
  0x38   :  { %p935_p10 = scmp.ne.s32.totalorder %s1200_s5, %s934_s2  ;;  %p938_p11 = scmp.lt.u32.totalorder %s934_s2, %s1200_s5 }
  0x3a   :  { %p940_p12 = pnand %p938_p11, %p935_p10 }
  0x3c   :  { %943 = shalt.err (!%p940_p12)
}
  0x3d   :  { %s944_s27 = scalar_lea.vmem %s63_s28, 128  ;;  %p949_p0 = scmp.lt.s32.totalorder %s63_s28, %s63_s28 }
  0x3e   :  { %p945_p13 = scmp.ne.s32.totalorder %s63_s28, %s944_s27  ;;  %p950_p1 = scmp.lt.s32.totalorder %s944_s27, %s944_s27 }
  0x40   :  { %p951_p2 = por %p950_p1, %p949_p0 }
  0x42   :  { %p952_p3 = pnand %p951_p2, %p945_p13 }
  0x44   :  { %955 = shalt.err (!%p952_p3)
}
  0x45   :  { %65 = dma.hbm_to_vmem [thread:$0]  %s1200_s5, 128, %s63_s28, [#allocation9]  }
  0x46   :  { %978 = dma.done.wait [#allocation3], 256  }
  0x47   :  { %979 = vsyncadd [#allocation3], 4294967040 }
  0x48   :  { %980 = dma.done.wait [#allocation6], 32  }
  0x49   :  { %981 = vsyncadd [#allocation6], 4294967264 }
  0x4a   :  { %982 = dma.done.wait [#allocation9], 128  }
  0x4b   :  { %983 = vsyncadd [#allocation9], 4294967168  ;;  %vm103_vm0 = vcmask 261120   ;;  %v185_v0 = vld [vmem:[%s1196_s1] sm:$0xff]  ;;  %v186_v1 = vld [vmem:[%s1196_s1 + $0x8] sm:$0xff]  ;;  %v992_v15 = vmov 0.0|0.0  }
  0x4c   :  { %v187_v2 = vld [vmem:[%s1196_s1 + $0x10] sm:$0xff]  ;;  %v830_v3 = vpack.c.bf16 %v186_v1, %v185_v0  ;;  %v188_v4 = vld [vmem:[%s1196_s1 + $0x18] sm:$0xff]  ;;  %v88_v5 = vld [vmem:[#allocation2] sm:$0xff]  ;;  %vm993_vm1 = vmmov 0   ;;  %v994_v16 = vmov 0.0   ;;  %vm271_vm2 = vcmask 64512  }
  0x4d   :  { %v834_v6 = vpack.c.bf16 %v188_v4, %v187_v2  ;;  %784 = vmatprep.mubr.msk.f32.mxu1 %vm103_vm0, %v88_v5  ;;  %773 = vmatprep.mubr.msk.f32.mxu0 %vm103_vm0, %v88_v5  ;;  %v89_v7 = vld [vmem:[#allocation2 + $0x8] sm:$0xff]  ;;  %v92_v8 = vld [vmem:[%s1198_s3] sm:$0xff]  ;;  %v94_v11 = vld [vmem:[%s1198_s3 + $0x10] sm:$0xff]  ;;  %vm370_vm3 = vcmask 130048   ;;  %vm673_vm4 = vcmask 254976   ;;  %s995_s14 = smov [#allocation10]  }
  0x4e   :  { %831 = vmatprep.subr.bf16.mxu1 %v830_v3  ;;  %v93_v9 = vld [vmem:[%s1198_s3 + $0x8] sm:$0xff]  ;;  %v95_v12 = vld [vmem:[%s1198_s3 + $0x18] sm:$0xff]  ;;  %v725_v17 = vld [vmem:[#allocation5] ss:$0 sm:$0xff]  ;;  %s711_s15 = sshll.u32 %s995_s14, 4  ;;  %s712_s15 = int_to_ptr.vmem [resolvable:$true] %s711_s15 }
  0x4f   :  { %833 = vmatpush3.bf16.msra.mxu1 %v830_v3  ;;  %v822_v10 = vpack.c.bf16 %v93_v9, %v92_v8  ;;  %v1138_v13 = vld [vmem:[#allocation8] sm:$0xff]  ;;  %v826_v14 = vpack.c.bf16 %v95_v12, %v94_v11  ;;  %v91_v38 = vld [vmem:[%s1201_s6] sm:$0x3]  ;;  %v722_v41 = vld [vmem:[#allocation7] ss:$0 sm:$0xff]  ;;  %s956_s5 = scalar_lea.vmem %s712_s15, 32  ;;  %p961_p5 = scmp.lt.s32.totalorder %s712_s15, %s712_s15 }
  0x50   :  { %835 = vmatprep.subr.bf16.mxu1 %v834_v6  ;;  %v589_v51 = vld [vmem:[%s1202_s7] sm:$0xff]  ;;  %v590_v52 = vld [vmem:[%s1202_s7 + $0x8] sm:$0xff]  ;;  %v591_v54 = vld [vmem:[%s1202_s7 + $0x10] sm:$0xff]  ;;  %p957_p4 = scmp.ne.s32.totalorder %s712_s15, %s956_s5  ;;  %p962_p6 = scmp.lt.s32.totalorder %s956_s5, %s956_s5 }
  0x51   :  { %823 = vmatprep.subr.bf16.mxu0 %v822_v10  ;;  %v845_v53 = vpack.c.bf16 %v590_v52, %v589_v51  ;;  %v592_v55 = vld [vmem:[%s1202_s7 + $0x18] sm:$0xff]  ;;  %v733_v63 = vld [vmem:[%s1203_s8] ss:$0 sm:$0xff] }
  0x52   :  { %825 = vmatpush3.bf16.msra.mxu0 %v822_v10  ;;  %v848_v56 = vpack.c.bf16 %v592_v55, %v591_v54  ;;  %p963_p7 = por %p962_p6, %p961_p5 }
  0x53   :  { %837 = vmatpush3.bf16.msra.mxu1 %v834_v6  ;;  %827 = vmatprep.subr.bf16.mxu0 %v826_v14 }
  0x54   :  { %787 = vmatprep.subr.mxu1 %v1138_v13  ;;  %p964_p8 = pnand %p963_p7, %p957_p4 }
  0x56   :  { %785 = vmatmul.mubr.msk.f32.vlgmr.msra.gmra.mrb[0].mxu1 %vm103_vm0, %v89_v7  ;;  %829 = vmatpush3.bf16.msra.mxu0 %v826_v14 }
  0x57   :  { %788 = vmatpush3.msra.mxu1 %v1138_v13  ;;  %841 = vmatprep.subr.bf16.mxu0 %v992_v15 }
  0x58   :  { %838 = vmatprep.subr.bf16.mxu1 %v992_v15 }
  0x59   :  { %774 = vmatmul.mubr.msk.f32.vlgmr.msra.gmra.mrb[0].mxu0 %vm103_vm0, %v89_v7 }
  0x5a   :  { %803 = vmatprep.mubr.msk.f32.mxu0 %vm993_vm1, %v994_v16 }
 0x129   :  { %v786_v18 = vpop.f32.mrb[0].mxu1 }
 0x12a   :  { %v268_v19 = vadd.f32 %v786_v18, %v725_v17  ;;  %v262_v20 = vpop.f32.mrb[1].mxu1 }
 0x12b   :  { %v263_v21 = vadd.f32 %v725_v17, %v262_v20 }
 0x12c   :  { %v273_v22 = vsel %vm271_vm2, %v268_v19, -inf  ;;  %v775_v39 = vpop.f32.mrb[0].mxu0 }
 0x12d   :  { %v272_v23 = vsel %vm271_vm2, %v263_v21, -inf  ;;  %v176_v40 = vpop.f32.mrb[1].mxu0  ;;  %v182_v42 = vadd.f32 %v775_v39, %v722_v41 }
 0x12e   :  { %v274_v24 = vmax.f32 %v272_v23, %v273_v22  ;;  %v177_v43 = vadd.f32 %v722_v41, %v176_v40 }
 0x130   :  { %v275_v25 = vrot.slane %v274_v24, 4 }
 0x132   :  { %v276_v26 = vmax.f32 %v274_v24, %v275_v25 }
 0x134   :  { %v277_v27 = vrot.slane %v276_v26, 2 }
 0x136   :  { %v278_v28 = vmax.f32 %v276_v26, %v277_v27 }
 0x138   :  { %v279_v29 = vrot.slane %v278_v28, 1 }
 0x13a   :  { %v280_v30 = vmax.f32 %v278_v28, %v279_v29 }
 0x13c   :  { %v281_v31 = vsub.f32 %v263_v21, %v280_v30  ;;  %v282_v32 = vsub.f32 %v268_v19, %v280_v30 }
 0x13e   :  { %v283_v33 = vmul.f32 1.442695, %v281_v31  ;;  %v285_v34 = vmul.f32 1.442695, %v282_v32 }
 0x140   :  { %860 = vpow2.f32 %v283_v33 }
 0x141   :  { %862 = vpow2.f32 %v285_v34 }
 0x14a   :  { %v861_v35 = vpop.eup %860 }
 0x14b   :  { %v863_v36 = vpop.eup %862  ;;  %789 = vmatprep.mubr.msk.f32.mxu1 %vm271_vm2, %v861_v35 }
 0x14c   :  { %790 = vmatmul.mubr.msk.f32.vlgmr.msra.gmra.mrb[2].mxu1 %vm271_vm2, %v863_v36  ;;  %v842_v37 = vpack.c.bf16 %v863_v36, %v861_v35 }
 0x14d   :  { %796 = vmatprep.mubr.msk.f32.mxu1 %vm993_vm1, %v994_v16 }
 0x14e   :  { %843 = vmatpush3.bf16.msra.mxu0 %v842_v37 }
 0x14f   :  { %844 = vmatprep.subr.bf16.mxu0 %v992_v15 }
 0x151   :  { %804 = vmatmul.mubr.msk.f32.vlgmr.msra.gmra.mrb[2].mxu0 %vm370_vm3, %v91_v38 }
 0x152   :  { %819 = vmatprep.mubr.msk.f32.mxu0 %vm993_vm1, %v994_v16  ;;  %846 = vmatpush3.bf16.msra.mxu0 %v845_v53 }
 0x153   :  { %847 = vmatprep.subr.bf16.mxu0 %v992_v15  ;;  %v736_v15 = vld [vmem:[%s1205_s10] ss:$0 sm:$0xff] }
 0x156   :  { %849 = vmatpush3.bf16.msra.mxu0 %v848_v56 }
 0x21f   :  { %v791_v44 = vpop.f32.mrb[2].mxu1 }
 0x220   :  { %v369_v45 = vmul.f32 %v791_v44, %v182_v42  ;;  %v359_v46 = vpop.f32.mrb[3].mxu1 }
 0x221   :  { %v368_v47 = vmul.f32 %v359_v46, %v177_v43 }
 0x223   :  { %v839_v48 = vpack.c.bf16 %v369_v45, %v368_v47 }
 0x224   :  { %v510_v49 = vpop.f32.mrb[2].mxu0 }
 0x225   :  { %840 = vmatpush3.bf16.msra.mxu1 %v839_v48  ;;  %v805_v50 = vpop.f32.mrb[3].mxu0 }
 0x226   :  { %806 = vmatprep.subr.mxu1 %v994_v16 }
 0x228   :  { %797 = vmatmul.mubr.msk.f32.vlgmr.msra.gmra.mrb[4].mxu1 %vm370_vm3, %v91_v38 }
 0x229   :  { %807 = vmatpush3.msra.mxu1 %v1138_v13  ;;  %808 = vmatprep.mubr.msk.f32.mxu1 %vm993_vm1, %v994_v16  ;;  %v735_v13 = vld [vmem:[%s1204_s9] ss:$0 sm:$0xff] }
 0x22c   :  { %809 = vmatmul.mubr.msk.f32.vlgmr.msra.gmra.mrb[6].mxu1 %vm271_vm2, %v510_v49 }
 0x2fb   :  { %v440_v57 = vpop.f32.mrb[4].mxu1 }
 0x2fc   :  { %v798_v58 = vpop.f32.mrb[5].mxu1 }
 0x2ff   :  { %v583_v59 = vpop.f32.mrb[6].mxu1 }
 0x300   :  { %864 = vrcp.f32 %v583_v59  ;;  %v810_v60 = vpop.f32.mrb[7].mxu1 }
 0x30a   :  { %v865_v61 = vpop.eup %864 }
 0x30b   :  { %v588_v62 = vmul.f32 %v865_v61, %v440_v57 }
 0x30d   :  { %820 = vmatmul.mubr.msk.f32.vlgmr.msra.gmra.mrb[4].mxu0 %vm103_vm0, %v588_v62 }
 0x3e0   :  { %v669_v0 = vpop.f32.mrb[4].mxu0 }
 0x3e1   :  { %v670_v1 = vadd.f32 %v733_v63, %v669_v0  ;;  %v821_v2 = vpop.f32.mrb[5].mxu0 }
 0x3e3   :  { %v674_v3 = vsel %vm673_vm4, %v670_v1, 0.0 }
 0x3e4   :  { %675 = vadd.xlane.f32.xlu0 %v674_v3 }
 0x471   :  { %v676_v4 = vpop.xlane.xlu0 %675 }
 0x472   :  { %v678_v5 = vmul.f32 0.03125, %v676_v4 }
 0x474   :  { %v679_v6 = vsub.f32 %v670_v1, %v678_v5 }
 0x476   :  { %v680_v7 = vmul.f32 %v679_v6, %v679_v6 }
 0x478   :  { %v681_v8 = vsel %vm673_vm4, %v680_v7, 0.0 }
 0x479   :  { %682 = vadd.xlane.f32.xlu0 %v681_v8 }
 0x506   :  { %v683_v9 = vpop.xlane.xlu0 %682 }
 0x507   :  { %v684_v10 = vmul.f32 0.03125, %v683_v9 }
 0x509   :  { %v685_v11 = vadd.f32 1e-05, %v684_v10 }
 0x50b   :  { %866 = vrsqrt.f32 %v685_v11 }
 0x515   :  { %v867_v12 = vpop.eup %866 }
 0x516   :  { %v687_v14 = vmul.f32 %v867_v12, %v679_v6 }
 0x518   :  { %v695_v16 = vmul.f32 %v735_v13, %v687_v14 }
 0x51a   :  { %v703_v17 = vadd.f32 %v736_v15, %v695_v16 }
 0x51c   :  { %704 = vst.msk [vmem:[#allocation10] sm:$0x3] %vm673_vm4, %v703_v17 }
 0x51d   :  { %967 = shalt.err (!%p964_p8)
}
 0x51e   :  { %s968_s16 = scalar_lea.hbm %s1206_s11, 32 }
 0x51f   :  { %p969_p9 = scmp.ne.s32.totalorder %s1206_s11, %s968_s16  ;;  %p972_p10 = scmp.lt.u32.totalorder %s968_s16, %s1206_s11 }
 0x521   :  { %p974_p11 = pnand %p972_p10, %p969_p9 }
 0x523   :  { %977 = shalt.err (!%p974_p11)
}
 0x524   :  { %714 = dma.vmem_to_hbm [thread:$0]  %s712_s15, 32, %s1206_s11, [#allocation4]  }
 0x525   :  { %984 = dma.done.wait [#allocation4], 32  }
 0x526   :  { %985 = vsyncadd [#allocation4], 4294967264 }
 0x527   :  { %718 = vsyncpa [#allocation3], 1 }
 0x528   :  { %719 = vsyncpa [#allocation6], 1 }
 0x529   :  { %720 = vsyncpa [#allocation9], 1 }
 0x52a   :  { %721 = vsyncpa [#allocation4], 1 }

</bundles_post_ra>
